<compile_context>
chip_gen: v5e
topology: v5e:2x2
jax: 0.10.0
libtpu: 0.0.40
codegen_flags: <defaults>
</compile_context>

<pallas_src>
import jax
import jax.numpy as jnp
from jax.experimental import pallas as pl
from jax.experimental.pallas import tpu as pltpu

IN_FEATURES = 1024
OUT_FEATURES = 64


def _round_up(a, m):
    return ((a + m - 1) // m) * m


def _orthfc_kernel(x_ref, w_ref, o_ref):
    """One batch tile: y = x @ W. x tile is loaded f32 and cast to the
    (bf16) weight dtype in-kernel; accumulation stays f32 on the MXU."""
    x = x_ref[...].astype(w_ref.dtype)
    o_ref[...] = jnp.dot(
        x, w_ref[...], preferred_element_type=jnp.float32
    ).astype(o_ref.dtype)


def _orthfc_bias_kernel(x_ref, w_ref, b_ref, o_ref):
    """One batch tile: y = x @ W + b (bias added in f32)."""
    x = x_ref[...].astype(w_ref.dtype)
    acc = jnp.dot(x, w_ref[...], preferred_element_type=jnp.float32)
    o_ref[...] = (acc + b_ref[...]).astype(o_ref.dtype)


def orthfc_forward(x, w, b=None, *, tm=2048, compute_dtype=jnp.bfloat16,
                   min_pallas_rows=64, vmem_budget_bytes=40 << 20):
    """y = x @ w (+ b).

    x: (B, K) float32, w: (K, N) float32, b: optional (N,) float32.
    x stays f32 in HBM and is cast to `compute_dtype` in-kernel;
    accumulation is f32; output dtype matches x.
    """
    B, K = x.shape
    Kw, N = w.shape
    assert K == Kw, "feature dims must match"
    out_dtype = x.dtype

    # ---- tiny-batch fallback: standalone pallas_call is launch-overhead bound ----
    if B < min_pallas_rows:
        y = jnp.dot(x.astype(compute_dtype), w.astype(compute_dtype),
                    preferred_element_type=jnp.float32)
        if b is not None:
            y = y + b.astype(jnp.float32)[None, :]
        return y.astype(out_dtype)

    # ---- lane-dense output: pad weight columns up to a multiple of 128 ----
    n_pad = max(128, _round_up(N, 128))
    wq = w.astype(compute_dtype)
    if n_pad != N:
        wq = jnp.pad(wq, ((0, 0), (0, n_pad - N)))  # tiny (K x 128), one-time-ish

    # ---- batch tile selection ----
    row_align = 16
    x_bytes = jnp.dtype(x.dtype).itemsize
    w_bytes = jnp.dtype(compute_dtype).itemsize
    o_bytes = jnp.dtype(out_dtype).itemsize
    # double-buffered x tile + double-buffered out tile per row
    per_row = 2 * (K * x_bytes + n_pad * o_bytes)
    tm_cap = max(row_align, ((vmem_budget_bytes // per_row) // row_align) * row_align)
    # at least 2 grid steps when B fits in one tile -> both v7x TCs get work
    half_rows = max(row_align, _round_up(pl.cdiv(B, 2), row_align))
    tm_eff = min(tm, tm_cap, half_rows)
    grid = (pl.cdiv(B, tm_eff),)

    # explicit scoped-VMEM limit (v5e default 16 MiB would bind at big tiles)
    vmem_limit = per_row * tm_eff + 2 * K * n_pad * w_bytes + (4 << 20)
    vmem_limit = int(min(max(vmem_limit, 32 << 20), 56 << 20))

    in_specs = [
        pl.BlockSpec((tm_eff, K), lambda i: (i, 0)),    # x batch tile (f32 in HBM)
        pl.BlockSpec((K, n_pad), lambda i: (0, 0)),     # weight resident across grid
    ]
    args = [x, wq]
    kernel = _orthfc_kernel

    if b is not None:
        bq = b.astype(jnp.float32).reshape(1, N)
        if n_pad != N:
            bq = jnp.pad(bq, ((0, 0), (0, n_pad - N)))
        in_specs.append(pl.BlockSpec((1, n_pad), lambda i: (0, 0)))  # bias resident
        args.append(bq)
        kernel = _orthfc_bias_kernel

    cost = pl.CostEstimate(
        flops=2 * B * K * n_pad,
        transcendentals=0,
        bytes_accessed=B * K * x_bytes + K * n_pad * w_bytes + B * n_pad * o_bytes,
    )

    y = pl.pallas_call(
        kernel,
        out_shape=jax.ShapeDtypeStruct((B, n_pad), out_dtype),
        grid_spec=pltpu.PrefetchScalarGridSpec(
            num_scalar_prefetch=0,
            grid=grid,
            in_specs=in_specs,
            out_specs=pl.BlockSpec((tm_eff, n_pad), lambda i: (i, 0)),
        ),
        compiler_params=pltpu.CompilerParams(
            dimension_semantics=("parallel",),  # batch axis -> megacore on v7x
            vmem_limit_bytes=vmem_limit,
        ),
        cost_estimate=cost,
    )(*args)

    return y[:, :N] if n_pad != N else y


def make_orthogonal_weight(key, dimin=IN_FEATURES, dimout=OUT_FEATURES):
    """Deterministic (dimin, dimout) matrix with orthonormal columns,
    mimicking geotorch.orthogonal on newLinear.weight (dimin >= dimout)."""
    a = jax.random.normal(key, (dimin, dimout), dtype=jnp.float32)
    q, _ = jnp.linalg.qr(a)  # q.T @ q = I_dimout
    return q.astype(jnp.float32)


if __name__ == "__main__":
    key = jax.random.PRNGKey(0)
    kx, kw, kb, kx2 = jax.random.split(key, 4)

    # B=200 exercises the Pallas path: 2 "parallel" grid steps and a ragged
    # (masked-store) last batch tile.
    B = 200
    x = jax.random.normal(kx, (B, IN_FEATURES), dtype=jnp.float32)
    w = make_orthogonal_weight(kw)

    # --- bias=False path (matches ORTHFC(1024, 64, bias=False)) ---
    y = jax.block_until_ready(orthfc_forward(x, w))
    assert y.shape == (B, OUT_FEATURES)

    # Reference with the same bf16 input rounding + f32 accumulation.
    y_ref = jnp.dot(x.astype(jnp.bfloat16), w.astype(jnp.bfloat16),
                    preferred_element_type=jnp.float32)
    assert jnp.allclose(y, y_ref, atol=1e-2, rtol=1e-2)
    # Sanity vs. full-f32 math (bf16 input rounding only).
    assert jnp.allclose(y, x @ w, atol=5e-2, rtol=5e-2)

    # --- bias=True path (ORTHFC supports bias) ---
    b = jax.random.normal(kb, (OUT_FEATURES,), dtype=jnp.float32) * 0.1
    yb = jax.block_until_ready(orthfc_forward(x, w, b))
    assert jnp.allclose(yb, y_ref + b[None, :], atol=1e-2, rtol=1e-2)

    # --- tiny-batch path: falls back to plain XLA dot (no pallas launch) ---
    x_small = jax.random.normal(kx2, (8, IN_FEATURES), dtype=jnp.float32)
    ys = jax.block_until_ready(orthfc_forward(x_small, w))
    ys_ref = jnp.dot(x_small.astype(jnp.bfloat16), w.astype(jnp.bfloat16),
                     preferred_element_type=jnp.float32)
    assert jnp.allclose(ys, ys_ref, atol=1e-2, rtol=1e-2)

    print("KERNEL_OK")
</pallas_src>

<mosaic_0001>
module attributes {stable_mosaic.version = 11 : i64} {
  func.func @_orthfc_kernel(%arg0: i32, %arg1: memref<112x1024xf32, #tpu.memory_space<vmem>>, %arg2: memref<1024x128xbf16, #tpu.memory_space<vmem>>, %arg3: memref<112x128xf32, #tpu.memory_space<vmem>>) attributes {dimension_semantics = [#tpu.dimension_semantics<parallel>], iteration_bounds = array<i64: 2>, scalar_prefetch = 0 : i64, scratch_operands = 0 : i64, tpu.core_type = #tpu.core_type<tc>, window_params = [{transform_indices = @transform_0, window_bounds = array<i64: 112, 1024>}, {pipeline_mode = #tpu.pipeline_mode<synchronous>, transform_indices = @transform_1, window_bounds = array<i64: 1024, 128>}, {transform_indices = @transform_2, window_bounds = array<i64: 112, 128>}]} {
    %c0 = arith.constant 0 : index
    %c0_0 = arith.constant 0 : index
    %0 = vector.load %arg1[%c0, %c0_0] : memref<112x1024xf32, #tpu.memory_space<vmem>>, vector<112x1024xf32>
    %1 = arith.truncf %0 : vector<112x1024xf32> to vector<112x1024xbf16>
    %c0_1 = arith.constant 0 : index
    %c0_2 = arith.constant 0 : index
    %2 = vector.load %arg2[%c0_1, %c0_2] : memref<1024x128xbf16, #tpu.memory_space<vmem>>, vector<1024x128xbf16>
    %cst = arith.constant dense<0.000000e+00> : vector<112x128xf32>
    %3 = tpu.matmul %1, %2, %cst {dimension_numbers = #tpu.dot_dimension_numbers<[1], [0], [0], [1], [0, 0, 1, 1], [], []>} : vector<112x1024xbf16>, vector<1024x128xbf16>, vector<112x128xf32> -> vector<112x128xf32>
    %c0_3 = arith.constant 0 : index
    %c0_4 = arith.constant 0 : index
    %4 = vector.load %arg3[%c0_3, %c0_4] : memref<112x128xf32, #tpu.memory_space<vmem>>, vector<112x128xf32>
    tpu.vector_store %arg3[%c0_3, %c0_4], %3 {strides = array<i32>} : memref<112x128xf32, #tpu.memory_space<vmem>>, vector<112x128xf32>,
    return
  }
  func.func @transform_0(%arg0: i32) -> (i32, i32) {
    %c0_i32 = arith.constant 0 : i32
    %c0_i32_0 = arith.constant 0 : i32
    return %arg0, %c0_i32 : i32, i32
  }
  func.func @transform_1(%arg0: i32) -> (i32, i32) {
    %c0_i32 = arith.constant 0 : i32
    %c0_i32_0 = arith.constant 0 : i32
    %c0_i32_1 = arith.constant 0 : i32
    return %c0_i32, %c0_i32_0 : i32, i32
  }
  func.func @transform_2(%arg0: i32) -> (i32, i32) {
    %c0_i32 = arith.constant 0 : i32
    %c0_i32_0 = arith.constant 0 : i32
    return %arg0, %c0_i32 : i32, i32
  }
}

</mosaic_0001>

<bundles_post_ra>
// kernel: tpu_custom_call.1
= control target key start
LH: loop header
LB: loop body
LE: loop exit
PB: predicated region body
PF: predicated region fallthrough
CT: control target
= control target key end

     0   :  { %7 = vsyncpa [#allocation3], 0  ;;  %s2305_s0 = inlined_call_operand.hbm [shape: f32[200,1024], index: 0, kind: input, shape index: {}]   ;;  %s2306_s1 = inlined_call_operand.hbm [shape: bf16[1024,128], index: 1, kind: input, shape index: {}]   ;;  %s2307_s2 = inlined_call_operand.hbm [shape: f32[200,128], index: 2, kind: output, shape index: {}]  }
   0x1   :  { %9 = vsyncpa [#allocation3 + $0x1], 0 }
   0x2   :  { %10 = vsyncpa [#allocation6], 0 }
   0x3   :  { %11 = vsyncpa [#allocation4], 0 }
   0x4   :  { %13 = vsyncpa [#allocation4 + $0x1], 0  ;;  %s1933_s9 = smov 0   ;;  %s1935_s10 = smov 0  }
   0x5   :  { %s1937_s11 = smov 0   ;;  %s1939_s12 = smov 0  }
   0x6 LB: > { %s1954_s13 = sadd.s32 4294967295, %s1907_s12   ;;  %s1353_s14 = sadd.s32 4294967294, %s1907_s12   ;;  %s1907_s12 = sphi %s1939_s12, %s2324_s12   ;;  %s1903_s11 = sphi %s1937_s11, %s2323_s11   ;;  %s1899_s10 = sphi %s1935_s10, %s2322_s10   ;;  %s1895_s9 = sphi %s1933_s9, %s2321_s9  }
   0x7   : > { %s1958_s15 = sadd.s32 1, %s1907_s12   ;;  %s26_s16 = sadd.s32 1, %s1903_s11 }
   0x8   : > { %s23_s17 = ssub.s32 %s1907_s12, %s1958_s15  ;;  %p33_p0 = scmp.ne.s32.totalorder %s1903_s11, %s1899_s10 }
   0x9   : > { %p24_p1 = scmp.eq.s32.totalorder %s23_s17, 0  ;;  %p34_p2 = scmp.eq.s32.totalorder %s1907_s12, 0 }
   0xa   : > { %p39_p3 = scmp.ne.s32.totalorder %s1899_s10, %s1895_s9  ;;  %p2309_p4 = scmp.eq.s32.totalorder %s1954_s13, 0 }
   0xb   : > { %s1970_s18 = scalar_select %p24_p1, %s1903_s11, %s26_s16  }
   0xc   : > { %p1972_p5 = por %p34_p2, %p33_p0  ;;  %p1978_p6 = por %p2309_p4, %p39_p3 }
   0xd   : > { %p84_p7 = scmp.eq.s32.totalorder %s1954_s13, 1  ;;  %p90_p8 = scmp.eq.s32.totalorder %s1353_s14, 1 }
   0xe   : > { %p1354_p9 = scmp.ge.s32.totalorder %s1907_s12, 1  ;;  %p97_p10 = scmp.lt.s32.totalorder %s1907_s12, 3 }
   0xf   : > { %p1985_p11 = por %p84_p7, %p33_p0  ;;  %p1989_p12 = por %p90_p8, %p39_p3 }
  0x10   : > { %p1993_p13 = pnand %p1354_p9, %p97_p10  ;;  %s108_s26 = sshll.u32 %s2306_s1, 4  ;;  %s109_s26 = int_to_ptr.hbm [resolvable:$true] %s108_s26 }
  0x11   : > { %s2313_s22 = scalar_select %p1989_p12, 1, 0 }
  0x12   : > { %p1707_p1 = pneg %p1993_p13  ;;  %s1909_s27 = smov [#allocation5]  }
  0x13   : > { %s110_s28 = sshll.u32 %s1909_s27, 4  ;;  %s1910_s29 = smov 64   ;;  %s111_s28 = int_to_ptr.vmem [resolvable:$true] %s110_s28 }
  0x14   : > { %p1708_p0 = pnand %p1707_p1, %p2309_p4  ;;  %s1911_s30 = smov 4  }
  0x15   : > { %p2308_p2 = scmp.ge.s32.totalorder %s1907_s12, 2 }
  0x16   : > { %1710 = dma.hbm_to_vmem [thread:$0]  (!%p1708_p0), %s109_s26, 8192, %s111_s28, [#allocation6], %s1910_s29, %s1910_s29, %s1911_s30  }
  0x17   : > { %120 = sbr.rel (%p2308_p2) target bundleno = 66 (0x42), region = 20 }
  0x1c   : > { %123 = sbr.rel (!%p1972_p5) target bundleno = 66 (0x42), region = 24  ;;  %s124_s3 = sand.u32 (%p1972_p5), 1, %s1903_s11  }
  0x1d   : > { %s129_s4 = smul.u32 (%p1972_p5), 14, %s1907_s12  ;;  %s2014_s16 = scalar_lea.sflag (%p1972_p5), [#allocation3], %s124_s3 }
  0x1e   : > { %s1698_s5 = smul.u32 (%p1972_p5), 896, %s124_s3 }
  0x1f   : > { %s130_s6 = ssub.s32 (%p1972_p5), 25, %s129_s4 }
  0x20   : > { %p131_p3 = scmp.lt.s32.totalorder (%p1972_p5), %s130_s6, 14  ;;  %s128_s17 = scalar_lea.vmem (%p1972_p5), [#allocation2], %s1698_s5 }
  0x22   : > { %s2326_s6 = smov (!%p131_p3, %s130_s6), 14 }
  0x23   : > { %s1629_s7 = sshll.u32 %s2326_s6, 6 }
  0x24   : > { %s135_s8 = ssub.s32 896, %s1629_s7 }
  0x25   : > { %s136_s14 = sshll.u32 %s135_s8, 4 }
  0x26   : > { %137 = vsyncadd %s2014_s16, %s136_s14  ;;  %p2017_p5 = scmp.ne.s32.totalorder %s1629_s7, 0  ;;  %s1697_s24 = smul.u32 896, %s1907_s12 }
  0x27   : > { %s2022_s25 = sshll.u32 %s128_s17, 4  ;;  %s1363_s26 = sshll.u32 %s2326_s6, 10  ;;  %s146_s25 = int_to_ptr.vmem [resolvable:$true] %s2022_s25 }
  0x28   : > { %s141_s29 = scalar_lea.hbm %s2305_s0, %s1697_s24  ;;  %s1789_s4 = sshrl.u32 %s1363_s26, 4 }
  0x29   : > { %s143_s30 = sshll.u32 %s141_s29, 4  ;;  %s1798_s14 = scalar_lea.hbm %s2305_s0, 1600  ;;  %s2029_s30 = int_to_ptr.hbm [resolvable:$true] %s143_s30 }
  0x2a   : > { %s1787_s3 = sshra.s32 %s2029_s30, 4  ;;  %s1788_s3 = int_to_ptr.hbm [resolvable:$true] %s1787_s3 }
  0x2b   : > { %s1794_s5 = scalar_lea.hbm %s1788_s3, %s1789_s4  ;;  %p1799_p10 = scmp.lt.s32.totalorder %s1788_s3, %s2305_s0 }
  0x2c   : > { %p1795_p7 = scmp.ne.s32.totalorder %s1788_s3, %s1794_s5  ;;  %p1800_p1 = scmp.lt.s32.totalorder %s1798_s14, %s1794_s5 }
  0x2e   : > { %p1796_p8 = pnand %p1795_p7, %p2017_p5  ;;  %p1801_p0 = por %p1800_p1, %p1799_p10 }
  0x30   : > { %p1797_p9 = pneg %p1796_p8 }
  0x32   : > { %p1802_p3 = pnand %p1801_p0, %p1797_p9 }
  0x34   : > { %1805 = shalt.err (!%p1802_p3)
}
  0x35   : > { %s1806_s27 = sshra.s32 %s146_s25, 4  ;;  %s1912_s29 = smov [#allocation2]   ;;  %s1807_s27 = int_to_ptr.vmem [resolvable:$true] %s1806_s27 }
  0x36   : > { %s1813_s28 = scalar_lea.vmem %s1807_s27, %s1789_s4  ;;  %s1817_s7 = scalar_lea.vmem %s1912_s29, 1792 }
  0x37   : > { %p1814_p7 = scmp.ne.s32.totalorder %s1807_s27, %s1813_s28  ;;  %p1819_p4 = scmp.lt.s32.totalorder %s1817_s7, %s1813_s28 }
  0x39   : > { %p1815_p8 = pnand %p1814_p7, %p2017_p5 }
  0x3b   : > { %p1816_p2 = pneg %p1815_p8 }
  0x3d   : > { %p1821_p12 = pnand %p1819_p4, %p1816_p2 }
  0x3f   : > { %1824 = shalt.err (!%p1821_p12)
}
  0x40   : > { %s1913_s3 = smov 1024   ;;  %s1914_s5 = smov 64  }
  0x41   : > { %151 = dma.hbm_to_vmem [thread:$0]  (%p2017_p5), %s2029_s30, %s1363_s26, %s146_s25, %s2014_s16, %s1913_s3, %s1913_s3, %s1914_s5  }
  0x42 PF: > { %157 = sbr.rel (%p1993_p13) target bundleno = 493 (0x1ed), region = 28  ;;  %s2057_s4 = sand.u32 (!%p1993_p13), 1, %s1899_s10  }
  0x43   : > { %s1699_s8 = smul.u32 (!%p1993_p13), 896, %s2057_s4  ;;  %s160_s14 = scalar_lea.sflag (!%p1993_p13), [#allocation3], %s2057_s4 }
  0x45   : > { %s2061_s17 = scalar_lea.vmem (!%p1993_p13), [#allocation2], %s1699_s8 }
  0x47   : > { %1882 = dma.done.wait (%p1978_p6), %s160_s14, 14336  }
  0x48   : > { %1884 = vsyncadd (%p1978_p6), %s160_s14, 4294952960  ;;  %p2316_p4 = scmp.eq.s32.totalorder %s1954_s13, 0 }
  0x4a   : > { %1886 = dma.done.wait (%p2316_p4), [#allocation6], 8192   ;;  %p2317_p12 = pmov %p2316_p4 }
  0x4b   : > { %v1639_v0 = vld [vmem:[#allocation5 + $0x38] sm:$0xff]  ;;  %v1638_v4 = vld [vmem:[#allocation5 + $0x30] sm:$0xff]  ;;  %v1637_v8 = vld [vmem:[#allocation5 + $0x28] sm:$0xff]  ;;  %s1700_s20 = smul.u32 112, %s2057_s4  ;;  %s1248_s6 = scalar_lea.sflag [#allocation4], %s2057_s4 }
  0x4c   : > { %1888 = vsyncadd (%p2317_p12), [#allocation6], 4294959104  ;;  %v1647_v1 = vld [vmem:[#allocation5 + $0x78] sm:$0xff]  ;;  %881 = vmatpush.bf16.msra.mxu0 %v1639_v0  ;;  %v1646_v5 = vld [vmem:[#allocation5 + $0x70] sm:$0xff]  ;;  %s1255_s16 = smul.u32 (%p1985_p11), 14, %s1954_s13 }
  0x4d   : > { %v1655_v2 = vld [vmem:[#allocation5 + $0xb8] sm:$0xff]  ;;  %925 = vmatpush.bf16.msra.mxu1 %v1647_v1  ;;  %v1654_v6 = vld [vmem:[#allocation5 + $0xb0] sm:$0xff]  ;;  %v1645_v9 = vld [vmem:[#allocation5 + $0x68] sm:$0xff]  ;;  %s2214_s23 = scalar_lea.vmem [#allocation7], %s1700_s20 }
  0x4e   : > { %v1663_v3 = vld [vmem:[#allocation5 + $0xf8] sm:$0xff]  ;;  %969 = vmatpush.bf16.msra.mxu2 %v1655_v2  ;;  %v1662_v7 = vld [vmem:[#allocation5 + $0xf0] sm:$0xff]  ;;  %v1653_v10 = vld [vmem:[#allocation5 + $0xa8] sm:$0xff]  ;;  %s1256_s19 = ssub.s32 (%p1985_p11), 25, %s1255_s16 }
  0x4f   : > { %1013 = vmatpush.bf16.msra.mxu3 %v1663_v3  ;;  %v1661_v11 = vld [vmem:[#allocation5 + $0xe8] sm:$0xff]  ;;  %v1636_v12 = vld [vmem:[#allocation5 + $0x20] sm:$0xff]  ;;  %v1635_v16 = vld [vmem:[#allocation5 + $0x18] sm:$0xff]  ;;  %p1257_p6 = scmp.lt.s32.totalorder (%p1985_p11), %s1256_s19, 14 }
  0x50   : > { %882 = vmatpush.bf16.msra.mxu0 %v1638_v4  ;;  %v1644_v13 = vld [vmem:[#allocation5 + $0x60] sm:$0xff]  ;;  %v1643_v17 = vld [vmem:[#allocation5 + $0x58] sm:$0xff]  ;;  %v1634_v20 = vld [vmem:[#allocation5 + $0x10] sm:$0xff] }
  0x51   : > { %926 = vmatpush.bf16.msra.mxu1 %v1646_v5  ;;  %v1652_v14 = vld [vmem:[#allocation5 + $0xa0] sm:$0xff]  ;;  %v1651_v18 = vld [vmem:[#allocation5 + $0x98] sm:$0xff]  ;;  %v1642_v21 = vld [vmem:[#allocation5 + $0x50] sm:$0xff] }
  0x52   : > { %970 = vmatpush.bf16.msra.mxu2 %v1654_v6  ;;  %v1660_v15 = vld [vmem:[#allocation5 + $0xe0] sm:$0xff]  ;;  %v1659_v19 = vld [vmem:[#allocation5 + $0xd8] sm:$0xff]  ;;  %v1650_v22 = vld [vmem:[#allocation5 + $0x90] sm:$0xff] }
  0x53   : > { %1014 = vmatpush.bf16.msra.mxu3 %v1662_v7  ;;  %v1658_v23 = vld [vmem:[#allocation5 + $0xd0] sm:$0xff]  ;;  %v1633_v24 = vld [vmem:[#allocation5 + $0x8] sm:$0xff]  ;;  %v1632_v28 = vld [vmem:[#allocation5] sm:$0xff] }
  0x54   : > { %883 = vmatpush.bf16.msra.mxu0 %v1637_v8  ;;  %v1641_v25 = vld [vmem:[#allocation5 + $0x48] sm:$0xff]  ;;  %v1640_v29 = vld [vmem:[#allocation5 + $0x40] sm:$0xff]  ;;  %v203_v36 = vld [vmem:[%s2061_s17 + $0x10] sm:$0xff] }
  0x55   : > { %927 = vmatpush.bf16.msra.mxu1 %v1645_v9  ;;  %v1649_v26 = vld [vmem:[#allocation5 + $0x88] sm:$0xff]  ;;  %v1648_v30 = vld [vmem:[#allocation5 + $0x80] sm:$0xff]  ;;  %v211_v37 = vld [vmem:[%s2061_s17 + $0x50] sm:$0xff] }
  0x56   : > { %971 = vmatpush.bf16.msra.mxu2 %v1653_v10  ;;  %v1657_v27 = vld [vmem:[#allocation5 + $0xc8] sm:$0xff]  ;;  %v1656_v31 = vld [vmem:[#allocation5 + $0xc0] sm:$0xff]  ;;  %v204_v38 = vld [vmem:[%s2061_s17 + $0x18] sm:$0xff]  ;;  %v315_v44 = vpack.c.bf16 %v211_v37, %v203_v36 }
  0x57   : > { %1015 = vmatpush.bf16.msra.mxu3 %v1661_v11  ;;  %v201_v32 = vld [vmem:[%s2061_s17] sm:$0xff]  ;;  %v202_v34 = vld [vmem:[%s2061_s17 + $0x8] sm:$0xff]  ;;  %v212_v39 = vld [vmem:[%s2061_s17 + $0x58] sm:$0xff] }
  0x58   : > { %884 = vmatpush.bf16.msra.mxu0 %v1636_v12  ;;  %v209_v33 = vld [vmem:[%s2061_s17 + $0x40] sm:$0xff]  ;;  %v210_v35 = vld [vmem:[%s2061_s17 + $0x48] sm:$0xff]  ;;  %v1687_v40 = vld [vmem:[#allocation5 + $0x1b8] sm:$0xff]  ;;  %v316_v45 = vpack.c.bf16 %v212_v39, %v204_v38 }
  0x59   : > { %928 = vmatpush.bf16.msra.mxu1 %v1644_v13  ;;  %v1671_v41 = vld [vmem:[#allocation5 + $0x138] sm:$0xff]  ;;  %v313_v42 = vpack.c.bf16 %v209_v33, %v201_v32  ;;  %v314_v43 = vpack.c.bf16 %v210_v35, %v202_v34  ;;  %v1686_v48 = vld [vmem:[#allocation5 + $0x1b0] sm:$0xff]  ;;  %v1685_v52 = vld [vmem:[#allocation5 + $0x1a8] sm:$0xff] }
  0x5a   : > { %972 = vmatpush.bf16.msra.mxu2 %v1652_v14  ;;  %v1695_v46 = vld [vmem:[#allocation5 + $0x1f8] sm:$0xff]  ;;  %v1670_v49 = vld [vmem:[#allocation5 + $0x130] sm:$0xff]  ;;  %v1669_v53 = vld [vmem:[#allocation5 + $0x128] sm:$0xff] }
  0x5b   : > { %1016 = vmatpush.bf16.msra.mxu3 %v1660_v15  ;;  %v1679_v47 = vld [vmem:[#allocation5 + $0x178] sm:$0xff]  ;;  %v1694_v50 = vld [vmem:[#allocation5 + $0x1f0] sm:$0xff]  ;;  %v1693_v54 = vld [vmem:[#allocation5 + $0x1e8] sm:$0xff] }
  0x5c   : > { %885 = vmatpush.bf16.msra.mxu0 %v1635_v16  ;;  %v1678_v51 = vld [vmem:[#allocation5 + $0x170] sm:$0xff]  ;;  %v1677_v55 = vld [vmem:[#allocation5 + $0x168] sm:$0xff]  ;;  %v217_v56 = vld [vmem:[%s2061_s17 + $0x80] sm:$0xff] }
  0x5d   : > { %929 = vmatpush.bf16.msra.mxu1 %v1643_v17  ;;  %v1684_v57 = vld [vmem:[#allocation5 + $0x1a0] sm:$0xff]  ;;  %v218_v60 = vld [vmem:[%s2061_s17 + $0x88] sm:$0xff]  ;;  %v219_v62 = vld [vmem:[%s2061_s17 + $0x90] sm:$0xff] }
  0x5e   : > { %973 = vmatpush.bf16.msra.mxu2 %v1651_v18  ;;  %v1668_v58 = vld [vmem:[#allocation5 + $0x120] sm:$0xff]  ;;  %v226_v61 = vld [vmem:[%s2061_s17 + $0xc8] sm:$0xff]  ;;  %v227_v63 = vld [vmem:[%s2061_s17 + $0xd0] sm:$0xff] }
  0x5f   : > { %1017 = vmatpush.bf16.msra.mxu3 %v1659_v19  ;;  %v225_v59 = vld [vmem:[%s2061_s17 + $0xc0] sm:$0xff]  ;;  %v220_v0 = vld [vmem:[%s2061_s17 + $0x98] sm:$0xff]  ;;  %v322_v5 = vpack.c.bf16 %v226_v61, %v218_v60  ;;  %v323_v6 = vpack.c.bf16 %v227_v63, %v219_v62  ;;  %v234_v14 = vld [vmem:[%s2061_s17 + $0x108] sm:$0xff] }
  0x60   : > { %886 = vmatpush.bf16.msra.mxu0 %v1634_v20  ;;  %v228_v1 = vld [vmem:[%s2061_s17 + $0xd8] sm:$0xff]  ;;  %v1692_v2 = vld [vmem:[#allocation5 + $0x1e0] sm:$0xff]  ;;  %v321_v4 = vpack.c.bf16 %v225_v59, %v217_v56  ;;  %v242_v15 = vld [vmem:[%s2061_s17 + $0x148] sm:$0xff] }
  0x61   : > { %930 = vmatpush.bf16.msra.mxu1 %v1642_v21  ;;  %v1676_v3 = vld [vmem:[#allocation5 + $0x160] sm:$0xff]  ;;  %v324_v7 = vpack.c.bf16 %v228_v1, %v220_v0  ;;  %v1683_v8 = vld [vmem:[#allocation5 + $0x198] sm:$0xff]  ;;  %v235_v16 = vld [vmem:[%s2061_s17 + $0x110] sm:$0xff]  ;;  %v330_v21 = vpack.c.bf16 %v242_v15, %v234_v14 }
  0x62   : > { %974 = vmatpush.bf16.msra.mxu2 %v1650_v22  ;;  %v1667_v9 = vld [vmem:[#allocation5 + $0x118] sm:$0xff]  ;;  %v233_v12 = vld [vmem:[%s2061_s17 + $0x100] sm:$0xff]  ;;  %v243_v17 = vld [vmem:[%s2061_s17 + $0x150] sm:$0xff] }
  0x63   : > { %1018 = vmatpush.bf16.msra.mxu3 %v1658_v23  ;;  %v1691_v10 = vld [vmem:[#allocation5 + $0x1d8] sm:$0xff]  ;;  %v241_v13 = vld [vmem:[%s2061_s17 + $0x140] sm:$0xff]  ;;  %v331_v22 = vpack.c.bf16 %v243_v17, %v235_v16  ;;  %v251_v32 = vld [vmem:[%s2061_s17 + $0x190] sm:$0xff] }
  0x64   : > { %887 = vmatpush.bf16.msra.mxu0 %v1633_v24  ;;  %v1675_v11 = vld [vmem:[#allocation5 + $0x158] sm:$0xff]  ;;  %v329_v20 = vpack.c.bf16 %v241_v13, %v233_v12  ;;  %v1682_v24 = vld [vmem:[#allocation5 + $0x190] sm:$0xff]  ;;  %v1680_v56 = vld [vmem:[#allocation5 + $0x180] sm:$0xff] }
  0x65   : > { %931 = vmatpush.bf16.msra.mxu1 %v1641_v25  ;;  %v236_v18 = vld [vmem:[%s2061_s17 + $0x118] sm:$0xff]  ;;  %v1666_v25 = vld [vmem:[#allocation5 + $0x110] sm:$0xff]  ;;  %v1672_v59 = vld [vmem:[#allocation5 + $0x140] sm:$0xff] }
  0x66   : > { %975 = vmatpush.bf16.msra.mxu2 %v1649_v26  ;;  %v244_v19 = vld [vmem:[%s2061_s17 + $0x158] sm:$0xff]  ;;  %v1690_v26 = vld [vmem:[#allocation5 + $0x1d0] sm:$0xff]  ;;  %v281_v60 = vld [vmem:[%s2061_s17 + $0x280] sm:$0xff] }
  0x67   : > { %1019 = vmatpush.bf16.msra.mxu3 %v1657_v27  ;;  %v332_v23 = vpack.c.bf16 %v244_v19, %v236_v18  ;;  %v1674_v27 = vld [vmem:[#allocation5 + $0x150] sm:$0xff]  ;;  %v252_v34 = vld [vmem:[%s2061_s17 + $0x198] sm:$0xff]  ;;  %v289_v61 = vld [vmem:[%s2061_s17 + $0x2c0] sm:$0xff] }
  0x68   : > { %888 = vmatpush.bf16.msra.mxu0 %v1632_v28  ;;  %v249_v28 = vld [vmem:[%s2061_s17 + $0x180] sm:$0xff]  ;;  %v259_v33 = vld [vmem:[%s2061_s17 + $0x1d0] sm:$0xff]  ;;  %v260_v35 = vld [vmem:[%s2061_s17 + $0x1d8] sm:$0xff] }
  0x69   : > { %932 = vmatpush.bf16.msra.mxu1 %v1640_v29  ;;  %v257_v29 = vld [vmem:[%s2061_s17 + $0x1c0] sm:$0xff]  ;;  %v339_v38 = vpack.c.bf16 %v259_v33, %v251_v32  ;;  %v340_v39 = vpack.c.bf16 %v260_v35, %v252_v34  ;;  %v282_v62 = vld [vmem:[%s2061_s17 + $0x288] sm:$0xff]  ;;  %v283_v0 = vld [vmem:[%s2061_s17 + $0x290] sm:$0xff] }
  0x6a   : > { %976 = vmatpush.bf16.msra.mxu2 %v1648_v30  ;;  %v250_v30 = vld [vmem:[%s2061_s17 + $0x188] sm:$0xff]  ;;  %v337_v36 = vpack.c.bf16 %v257_v29, %v249_v28  ;;  %v291_v1 = vld [vmem:[%s2061_s17 + $0x2d0] sm:$0xff]  ;;  %v300_v14 = vld [vmem:[%s2061_s17 + $0x318] sm:$0xff] }
  0x6b   : > { %1020 = vmatpush.bf16.msra.mxu3 %v1656_v31  ;;  %889 = vmatmul.bf16.vlgmr.msra.gmra.mxu0 %v313_v42  ;;  %v258_v31 = vld [vmem:[%s2061_s17 + $0x1c8] sm:$0xff]  ;;  %v299_v12 = vld [vmem:[%s2061_s17 + $0x310] sm:$0xff]  ;;  %v308_v15 = vld [vmem:[%s2061_s17 + $0x358] sm:$0xff] }
  0x6c   : > { %1057 = vmatpush.bf16.msrb.mxu0 %v1671_v41  ;;  %933 = vmatmul.bf16.vlgmr.msra.gmra.mxu1 %v314_v43  ;;  %v338_v37 = vpack.c.bf16 %v258_v31, %v250_v30  ;;  %v1665_v41 = vld [vmem:[#allocation5 + $0x108] sm:$0xff]  ;;  %v307_v13 = vld [vmem:[%s2061_s17 + $0x350] sm:$0xff]  ;;  %v364_v19 = vpack.c.bf16 %v308_v15, %v300_v14  ;;  %v221_v32 = vld [vmem:[%s2061_s17 + $0xa0] sm:$0xff] }
  0x6d   : > { %977 = vmatmul.bf16.vlgmr.msra.gmra.mxu2 %v315_v44  ;;  %1101 = vmatpush.bf16.msrb.mxu1 %v1679_v47  ;;  %v1689_v42 = vld [vmem:[#allocation5 + $0x1c8] sm:$0xff]  ;;  %v265_v44 = vld [vmem:[%s2061_s17 + $0x200] sm:$0xff]  ;;  %v363_v18 = vpack.c.bf16 %v307_v13, %v299_v12 }
  0x6e   : > { %1145 = vmatpush.bf16.msrb.mxu2 %v1687_v40  ;;  %1021 = vmatmul.bf16.vlgmr.msra.gmra.mxu3 %v316_v45  ;;  %v1681_v40 = vld [vmem:[#allocation5 + $0x188] sm:$0xff]  ;;  %v273_v45 = vld [vmem:[%s2061_s17 + $0x240] sm:$0xff] }
  0x6f   : > { %1189 = vmatpush.bf16.msrb.mxu3 %v1695_v46  ;;  %v1673_v43 = vld [vmem:[#allocation5 + $0x148] sm:$0xff]  ;;  %v229_v33 = vld [vmem:[%s2061_s17 + $0xe0] sm:$0xff] }
  0x70   : > { %1058 = vmatpush.bf16.msrb.mxu0 %v1670_v49  ;;  %v266_v46 = vld [vmem:[%s2061_s17 + $0x208] sm:$0xff]  ;;  %v275_v49 = vld [vmem:[%s2061_s17 + $0x250] sm:$0xff] }
  0x71   : > { %1102 = vmatpush.bf16.msrb.mxu1 %v1678_v51  ;;  %v274_v47 = vld [vmem:[%s2061_s17 + $0x248] sm:$0xff]  ;;  %v276_v51 = vld [vmem:[%s2061_s17 + $0x258] sm:$0xff] }
  0x72   : > { %1146 = vmatpush.bf16.msrb.mxu2 %v1686_v48  ;;  %v267_v48 = vld [vmem:[%s2061_s17 + $0x210] sm:$0xff]  ;;  %v290_v63 = vld [vmem:[%s2061_s17 + $0x2c8] sm:$0xff] }
  0x73   : > { %1190 = vmatpush.bf16.msrb.mxu3 %v1694_v50  ;;  %v268_v50 = vld [vmem:[%s2061_s17 + $0x218] sm:$0xff]  ;;  %v222_v34 = vld [vmem:[%s2061_s17 + $0xa8] sm:$0xff] }
  0x74   : > { %1059 = vmatpush.bf16.msrb.mxu0 %v1669_v53  ;;  %v346_v53 = vpack.c.bf16 %v274_v47, %v266_v46  ;;  %v230_v35 = vld [vmem:[%s2061_s17 + $0xe8] sm:$0xff] }
  0x75   : > { %1103 = vmatpush.bf16.msrb.mxu1 %v1677_v55  ;;  %v348_v55 = vpack.c.bf16 %v276_v51, %v268_v50 }
  0x76   : > { %1147 = vmatpush.bf16.msrb.mxu2 %v1685_v52  ;;  %v345_v52 = vpack.c.bf16 %v273_v45, %v265_v44 }
  0x77   : > { %1191 = vmatpush.bf16.msrb.mxu3 %v1693_v54  ;;  %v347_v54 = vpack.c.bf16 %v275_v49, %v267_v48 }
  0x78   : > { %1060 = vmatpush.bf16.msrb.mxu0 %v1668_v58  ;;  %v1688_v58 = vld [vmem:[#allocation5 + $0x1c0] sm:$0xff] }
  0x79   : > { %1104 = vmatpush.bf16.msrb.mxu1 %v1676_v3  ;;  %v292_v3 = vld [vmem:[%s2061_s17 + $0x2d8] sm:$0xff] }
  0x7a   : > { %1148 = vmatpush.bf16.msrb.mxu2 %v1684_v57  ;;  %v1664_v57 = vld [vmem:[#allocation5 + $0x100] sm:$0xff] }
  0x7b   : > { %1192 = vmatpush.bf16.msrb.mxu3 %v1692_v2  ;;  %894 = vmatmul.bf16.gmra.mxu0 %v321_v4  ;;  %v284_v2 = vld [vmem:[%s2061_s17 + $0x298] sm:$0xff]  ;;  %v353_v4 = vpack.c.bf16 %v289_v61, %v281_v60 }
  0x7c   : > { %938 = vmatmul.bf16.gmra.mxu1 %v322_v5  ;;  %1061 = vmatpush.bf16.msrb.mxu0 %v1667_v9  ;;  %v354_v5 = vpack.c.bf16 %v290_v63, %v282_v62  ;;  %v305_v9 = vld [vmem:[%s2061_s17 + $0x340] sm:$0xff]  ;;  %v240_v60 = vld [vmem:[%s2061_s17 + $0x138] sm:$0xff] }
  0x7d   : > { %982 = vmatmul.bf16.gmra.mxu2 %v323_v6  ;;  %1105 = vmatpush.bf16.msrb.mxu1 %v1675_v11  ;;  %v355_v6 = vpack.c.bf16 %v291_v1, %v283_v0  ;;  %v306_v11 = vld [vmem:[%s2061_s17 + $0x348] sm:$0xff]  ;;  %v248_v61 = vld [vmem:[%s2061_s17 + $0x178] sm:$0xff] }
  0x7e   : > { %1026 = vmatmul.bf16.gmra.mxu3 %v324_v7  ;;  %1149 = vmatpush.bf16.msrb.mxu2 %v1683_v8  ;;  %v356_v7 = vpack.c.bf16 %v292_v3, %v284_v2  ;;  %v297_v8 = vld [vmem:[%s2061_s17 + $0x300] sm:$0xff] }
  0x7f   : > { %1193 = vmatpush.bf16.msrb.mxu3 %v1691_v10  ;;  %v298_v10 = vld [vmem:[%s2061_s17 + $0x308] sm:$0xff]  ;;  %v361_v16 = vpack.c.bf16 %v305_v9, %v297_v8 }
  0x80   : > { %1062 = vmatpush.bf16.msrb.mxu0 %v1666_v25  ;;  %v362_v17 = vpack.c.bf16 %v306_v11, %v298_v10  ;;  %v215_v25 = vld [vmem:[%s2061_s17 + $0x70] sm:$0xff] }
  0x81   : > { %1106 = vmatpush.bf16.msrb.mxu1 %v1674_v27  ;;  %v216_v27 = vld [vmem:[%s2061_s17 + $0x78] sm:$0xff] }
  0x82   : > { %1150 = vmatpush.bf16.msrb.mxu2 %v1682_v24  ;;  %v207_v24 = vld [vmem:[%s2061_s17 + $0x30] sm:$0xff] }
  0x83   : > { %1194 = vmatpush.bf16.msrb.mxu3 %v1690_v26  ;;  %v208_v26 = vld [vmem:[%s2061_s17 + $0x38] sm:$0xff]  ;;  %v319_v30 = vpack.c.bf16 %v215_v25, %v207_v24 }
  0x84   : > { %1063 = vmatpush.bf16.msrb.mxu0 %v1665_v41  ;;  %v320_v31 = vpack.c.bf16 %v216_v27, %v208_v26  ;;  %v326_v41 = vpack.c.bf16 %v230_v35, %v222_v34 }
  0x85   : > { %1107 = vmatpush.bf16.msrb.mxu1 %v1673_v43 }
  0x86   : > { %1151 = vmatpush.bf16.msrb.mxu2 %v1681_v40  ;;  %v325_v40 = vpack.c.bf16 %v229_v33, %v221_v32 }
  0x87   : > { %1195 = vmatpush.bf16.msrb.mxu3 %v1689_v42 }
  0x88   : > { %1064 = vmatpush.bf16.msrb.mxu0 %v1664_v57  ;;  %v246_v57 = vld [vmem:[%s2061_s17 + $0x168] sm:$0xff] }
  0x89   : > { %1108 = vmatpush.bf16.msrb.mxu1 %v1672_v59  ;;  %v247_v59 = vld [vmem:[%s2061_s17 + $0x170] sm:$0xff] }
  0x8a   : > { %1152 = vmatpush.bf16.msrb.mxu2 %v1680_v56  ;;  %v238_v56 = vld [vmem:[%s2061_s17 + $0x128] sm:$0xff] }
  0x8b   : > { %899 = vmatmul.bf16.gmra.mxu0 %v329_v20  ;;  %1196 = vmatpush.bf16.msrb.mxu3 %v1688_v58  ;;  %v205_v20 = vld [vmem:[%s2061_s17 + $0x20] sm:$0xff]  ;;  %v239_v58 = vld [vmem:[%s2061_s17 + $0x130] sm:$0xff]  ;;  %v334_v1 = vpack.c.bf16 %v246_v57, %v238_v56 }
  0x8c   : > { %943 = vmatmul.bf16.gmra.mxu1 %v330_v21  ;;  %v213_v21 = vld [vmem:[%s2061_s17 + $0x60] sm:$0xff] }
  0x8d   : > { %987 = vmatmul.bf16.gmra.mxu2 %v331_v22  ;;  %v206_v22 = vld [vmem:[%s2061_s17 + $0x28] sm:$0xff]  ;;  %v317_v28 = vpack.c.bf16 %v213_v21, %v205_v20  ;;  %v255_v20 = vld [vmem:[%s2061_s17 + $0x1b0] sm:$0xff] }
  0x8e   : > { %1031 = vmatmul.bf16.gmra.mxu3 %v332_v23  ;;  %v214_v23 = vld [vmem:[%s2061_s17 + $0x68] sm:$0xff]  ;;  %v263_v21 = vld [vmem:[%s2061_s17 + $0x1f0] sm:$0xff] }
  0x8f   : > { %v318_v29 = vpack.c.bf16 %v214_v23, %v206_v22  ;;  %v256_v22 = vld [vmem:[%s2061_s17 + $0x1b8] sm:$0xff] }
  0x90   : > { %v264_v23 = vld [vmem:[%s2061_s17 + $0x1f8] sm:$0xff] }
  0x91   : > { %v344_v32 = vpack.c.bf16 %v264_v23, %v256_v22 }
  0x9b   : > { %904 = vmatmul.bf16.gmra.mxu0 %v337_v36  ;;  %v223_v36 = vld [vmem:[%s2061_s17 + $0xb0] sm:$0xff] }
  0x9c   : > { %948 = vmatmul.bf16.gmra.mxu1 %v338_v37  ;;  %v231_v37 = vld [vmem:[%s2061_s17 + $0xf0] sm:$0xff] }
  0x9d   : > { %992 = vmatmul.bf16.gmra.mxu2 %v339_v38  ;;  %v224_v38 = vld [vmem:[%s2061_s17 + $0xb8] sm:$0xff]  ;;  %v327_v44 = vpack.c.bf16 %v231_v37, %v223_v36 }
  0x9e   : > { %1036 = vmatmul.bf16.gmra.mxu3 %v340_v39  ;;  %v232_v39 = vld [vmem:[%s2061_s17 + $0xf8] sm:$0xff] }
  0x9f   : > { %v328_v45 = vpack.c.bf16 %v232_v39, %v224_v38 }
  0xab   : > { %909 = vmatmul.bf16.gmra.mxu0 %v345_v52 }
  0xac   : > { %953 = vmatmul.bf16.gmra.mxu1 %v346_v53 }
  0xad   : > { %997 = vmatmul.bf16.gmra.mxu2 %v347_v54  ;;  %v237_v54 = vld [vmem:[%s2061_s17 + $0x120] sm:$0xff] }
  0xae   : > { %1041 = vmatmul.bf16.gmra.mxu3 %v348_v55  ;;  %v245_v55 = vld [vmem:[%s2061_s17 + $0x160] sm:$0xff] }
  0xaf   : > { %v333_v0 = vpack.c.bf16 %v245_v55, %v237_v54 }
  0xbb   : > { %914 = vmatmul.bf16.gmra.mxu0 %v353_v4 }
  0xbc   : > { %958 = vmatmul.bf16.gmra.mxu1 %v354_v5  ;;  %v335_v5 = vpack.c.bf16 %v247_v59, %v239_v58 }
  0xbd   : > { %1002 = vmatmul.bf16.gmra.mxu2 %v355_v6  ;;  %v336_v6 = vpack.c.bf16 %v248_v61, %v240_v60 }
  0xbe   : > { %1046 = vmatmul.bf16.gmra.mxu3 %v356_v7 }
  0xcb   : > { %919 = vmatmul.bf16.gmra.mxu0 %v361_v16  ;;  %v253_v16 = vld [vmem:[%s2061_s17 + $0x1a0] sm:$0xff] }
  0xcc   : > { %963 = vmatmul.bf16.gmra.mxu1 %v362_v17  ;;  %v261_v17 = vld [vmem:[%s2061_s17 + $0x1e0] sm:$0xff] }
  0xcd   : > { %1007 = vmatmul.bf16.gmra.mxu2 %v363_v18  ;;  %v254_v18 = vld [vmem:[%s2061_s17 + $0x1a8] sm:$0xff]  ;;  %v341_v26 = vpack.c.bf16 %v261_v17, %v253_v16 }
  0xce   : > { %1051 = vmatmul.bf16.gmra.mxu3 %v364_v19  ;;  %v262_v19 = vld [vmem:[%s2061_s17 + $0x1e8] sm:$0xff] }
  0xcf   : > { %v342_v27 = vpack.c.bf16 %v262_v19, %v254_v18 }
  0xdb   : > { %1065 = vmatmul.bf16.vlgmr.msrb.gmra.mxu0 %v317_v28 }
  0xdc   : > { %1109 = vmatmul.bf16.vlgmr.msrb.gmra.mxu1 %v318_v29 }
  0xdd   : > { %1153 = vmatmul.bf16.vlgmr.msrb.gmra.mxu2 %v319_v30 }
  0xde   : > { %1197 = vmatmul.bf16.vlgmr.msrb.gmra.mxu3 %v320_v31  ;;  %v343_v31 = vpack.c.bf16 %v263_v21, %v255_v20 }
  0xe8   : > { %v890_v42 = vpop.f32.mrf.mxu0 }
  0xe9   : > { %v934_v43 = vpop.f32.mrf.mxu1 }
  0xea   : > { %v935_v46 = vadd.f32 %v934_v43, %v890_v42  ;;  %v269_v42 = vld [vmem:[%s2061_s17 + $0x220] sm:$0xff] }
  0xeb   : > { %1070 = vmatmul.bf16.gmra.mxu0 %v325_v40  ;;  %v277_v43 = vld [vmem:[%s2061_s17 + $0x260] sm:$0xff] }
  0xec   : > { %1114 = vmatmul.bf16.gmra.mxu1 %v326_v41 }
  0xed   : > { %1158 = vmatmul.bf16.gmra.mxu2 %v327_v44  ;;  %v270_v44 = vld [vmem:[%s2061_s17 + $0x228] sm:$0xff] }
  0xee   : > { %1202 = vmatmul.bf16.gmra.mxu3 %v328_v45  ;;  %v278_v45 = vld [vmem:[%s2061_s17 + $0x268] sm:$0xff] }
  0xef   : > { %v350_v54 = vpack.c.bf16 %v278_v45, %v270_v44 }
  0xf0   : > { %v978_v47 = vpop.f32.mrf.mxu2  ;;  %v892_v50 = vpop.f32.mrf.mxu0 }
  0xf1   : > { %v1022_v48 = vpop.f32.mrf.mxu3  ;;  %v979_v49 = vadd.f32 %v978_v47, %v935_v46  ;;  %v936_v51 = vpop.f32.mrf.mxu1  ;;  %v271_v46 = vld [vmem:[%s2061_s17 + $0x230] sm:$0xff] }
  0xf2   : > { %v937_v52 = vadd.f32 %v936_v51, %v892_v50  ;;  %v279_v47 = vld [vmem:[%s2061_s17 + $0x270] sm:$0xff] }
  0xf3   : > { %v2143_v53 = vadd.f32 %v1022_v48, %v979_v49  ;;  %v272_v48 = vld [vmem:[%s2061_s17 + $0x238] sm:$0xff]  ;;  %v351_v58 = vpack.c.bf16 %v279_v47, %v271_v46 }
  0xf4   : > { %v280_v49 = vld [vmem:[%s2061_s17 + $0x278] sm:$0xff] }
  0xf5   : > { %v352_v59 = vpack.c.bf16 %v280_v49, %v272_v48 }
  0xf8   : > { %v980_v62 = vpop.f32.mrf.mxu2  ;;  %v895_v3 = vpop.f32.mrf.mxu0 }
  0xf9   : > { %v1024_v63 = vpop.f32.mrf.mxu3  ;;  %v981_v2 = vadd.f32 %v980_v62, %v937_v52  ;;  %v939_v4 = vpop.f32.mrf.mxu1  ;;  %v349_v52 = vpack.c.bf16 %v277_v43, %v269_v42  ;;  %v312_v42 = vld [vmem:[%s2061_s17 + $0x378] sm:$0xff] }
  0xfa   : > { %v940_v7 = vadd.f32 %v939_v4, %v895_v3 }
  0xfb   : > { %v2153_v8 = vadd.f32 %v1024_v63, %v981_v2  ;;  %1075 = vmatmul.bf16.gmra.mxu0 %v333_v0 }
  0xfc   : > { %1119 = vmatmul.bf16.gmra.mxu1 %v334_v1 }
  0xfd   : > { %1163 = vmatmul.bf16.gmra.mxu2 %v335_v5  ;;  %v285_v5 = vld [vmem:[%s2061_s17 + $0x2a0] sm:$0xff] }
  0xfe   : > { %1207 = vmatmul.bf16.gmra.mxu3 %v336_v6  ;;  %v293_v6 = vld [vmem:[%s2061_s17 + $0x2e0] sm:$0xff] }
  0xff   : > { %v357_v17 = vpack.c.bf16 %v293_v6, %v285_v5 }
 0x100   : > { %v983_v9 = vpop.f32.mrf.mxu2  ;;  %v897_v12 = vpop.f32.mrf.mxu0 }
 0x101   : > { %v1027_v10 = vpop.f32.mrf.mxu3  ;;  %v984_v11 = vadd.f32 %v983_v9, %v940_v7  ;;  %v941_v13 = vpop.f32.mrf.mxu1  ;;  %v286_v7 = vld [vmem:[%s2061_s17 + $0x2a8] sm:$0xff] }
 0x102   : > { %v942_v14 = vadd.f32 %v941_v13, %v897_v12  ;;  %v294_v9 = vld [vmem:[%s2061_s17 + $0x2e8] sm:$0xff]  ;;  %v288_v12 = vld [vmem:[%s2061_s17 + $0x2b8] sm:$0xff] }
 0x103   : > { %v2155_v15 = vadd.f32 %v1027_v10, %v984_v11  ;;  %v287_v10 = vld [vmem:[%s2061_s17 + $0x2b0] sm:$0xff]  ;;  %v296_v13 = vld [vmem:[%s2061_s17 + $0x2f8] sm:$0xff]  ;;  %v358_v18 = vpack.c.bf16 %v294_v9, %v286_v7 }
 0x104   : > { %v295_v11 = vld [vmem:[%s2061_s17 + $0x2f0] sm:$0xff]  ;;  %v360_v23 = vpack.c.bf16 %v296_v13, %v288_v12 }
 0x105   : > { %v359_v22 = vpack.c.bf16 %v295_v11, %v287_v10 }
 0x108   : > { %v985_v24 = vpop.f32.mrf.mxu2  ;;  %v900_v29 = vpop.f32.mrf.mxu0 }
 0x109   : > { %v1029_v25 = vpop.f32.mrf.mxu3  ;;  %v986_v28 = vadd.f32 %v985_v24, %v942_v14  ;;  %v944_v30 = vpop.f32.mrf.mxu1 }
 0x10a   : > { %v945_v33 = vadd.f32 %v944_v30, %v900_v29 }
 0x10b   : > { %v2165_v34 = vadd.f32 %v1029_v25, %v986_v28  ;;  %1080 = vmatmul.bf16.gmra.mxu0 %v341_v26 }
 0x10c   : > { %1124 = vmatmul.bf16.gmra.mxu1 %v342_v27 }
 0x10d   : > { %1168 = vmatmul.bf16.gmra.mxu2 %v343_v31 }
 0x10e   : > { %1212 = vmatmul.bf16.gmra.mxu3 %v344_v32 }
 0x110   : > { %v988_v35 = vpop.f32.mrf.mxu2  ;;  %v902_v38 = vpop.f32.mrf.mxu0 }
 0x111   : > { %v1032_v36 = vpop.f32.mrf.mxu3  ;;  %v989_v37 = vadd.f32 %v988_v35, %v945_v33  ;;  %v946_v39 = vpop.f32.mrf.mxu1  ;;  %v301_v33 = vld [vmem:[%s2061_s17 + $0x320] sm:$0xff] }
 0x112   : > { %v947_v40 = vadd.f32 %v946_v39, %v902_v38  ;;  %v309_v35 = vld [vmem:[%s2061_s17 + $0x360] sm:$0xff]  ;;  %v303_v38 = vld [vmem:[%s2061_s17 + $0x330] sm:$0xff] }
 0x113   : > { %v2167_v41 = vadd.f32 %v1032_v36, %v989_v37  ;;  %v302_v36 = vld [vmem:[%s2061_s17 + $0x328] sm:$0xff]  ;;  %v311_v39 = vld [vmem:[%s2061_s17 + $0x370] sm:$0xff]  ;;  %v365_v45 = vpack.c.bf16 %v309_v35, %v301_v33 }
 0x114   : > { %v310_v37 = vld [vmem:[%s2061_s17 + $0x368] sm:$0xff] }
 0x115   : > { %v366_v46 = vpack.c.bf16 %v310_v37, %v302_v36 }
 0x118   : > { %v990_v50 = vpop.f32.mrf.mxu2  ;;  %v905_v56 = vpop.f32.mrf.mxu0 }
 0x119   : > { %v1034_v51 = vpop.f32.mrf.mxu3  ;;  %v991_v55 = vadd.f32 %v990_v50, %v947_v40  ;;  %v949_v57 = vpop.f32.mrf.mxu1  ;;  %v304_v40 = vld [vmem:[%s2061_s17 + $0x338] sm:$0xff]  ;;  %v367_v50 = vpack.c.bf16 %v311_v39, %v303_v38 }
 0x11a   : > { %v950_v60 = vadd.f32 %v949_v57, %v905_v56 }
 0x11b   : > { %v2177_v61 = vadd.f32 %v1034_v51, %v991_v55  ;;  %1085 = vmatmul.bf16.gmra.mxu0 %v349_v52  ;;  %v368_v51 = vpack.c.bf16 %v312_v42, %v304_v40 }
 0x11c   : > { %1129 = vmatmul.bf16.gmra.mxu1 %v350_v54 }
 0x11d   : > { %1173 = vmatmul.bf16.gmra.mxu2 %v351_v58 }
 0x11e   : > { %1217 = vmatmul.bf16.gmra.mxu3 %v352_v59 }
 0x120   : > { %v993_v62 = vpop.f32.mrf.mxu2  ;;  %v907_v1 = vpop.f32.mrf.mxu0 }
 0x121   : > { %v1037_v63 = vpop.f32.mrf.mxu3  ;;  %v994_v0 = vadd.f32 %v993_v62, %v950_v60  ;;  %v951_v2 = vpop.f32.mrf.mxu1 }
 0x122   : > { %v952_v3 = vadd.f32 %v951_v2, %v907_v1 }
 0x123   : > { %v2179_v4 = vadd.f32 %v1037_v63, %v994_v0 }
 0x128   : > { %v995_v14 = vpop.f32.mrf.mxu2  ;;  %v910_v20 = vpop.f32.mrf.mxu0 }
 0x129   : > { %v1039_v16 = vpop.f32.mrf.mxu3  ;;  %v996_v19 = vadd.f32 %v995_v14, %v952_v3  ;;  %v954_v21 = vpop.f32.mrf.mxu1 }
 0x12a   : > { %v955_v24 = vadd.f32 %v954_v21, %v910_v20 }
 0x12b   : > { %v2189_v25 = vadd.f32 %v1039_v16, %v996_v19  ;;  %1090 = vmatmul.bf16.gmra.mxu0 %v357_v17 }
 0x12c   : > { %1134 = vmatmul.bf16.gmra.mxu1 %v358_v18 }
 0x12d   : > { %1178 = vmatmul.bf16.gmra.mxu2 %v359_v22 }
 0x12e   : > { %1222 = vmatmul.bf16.gmra.mxu3 %v360_v23 }
 0x130   : > { %v998_v26 = vpop.f32.mrf.mxu2  ;;  %v912_v29 = vpop.f32.mrf.mxu0 }
 0x131   : > { %v1042_v27 = vpop.f32.mrf.mxu3  ;;  %v999_v28 = vadd.f32 %v998_v26, %v955_v24  ;;  %v956_v30 = vpop.f32.mrf.mxu1 }
 0x132   : > { %v957_v31 = vadd.f32 %v956_v30, %v912_v29 }
 0x133   : > { %v2191_v32 = vadd.f32 %v1042_v27, %v999_v28 }
 0x138   : > { %v1000_v43 = vpop.f32.mrf.mxu2  ;;  %v915_v48 = vpop.f32.mrf.mxu0 }
 0x139   : > { %v1044_v44 = vpop.f32.mrf.mxu3  ;;  %v1001_v47 = vadd.f32 %v1000_v43, %v957_v31  ;;  %v959_v49 = vpop.f32.mrf.mxu1 }
 0x13a   : > { %v960_v52 = vadd.f32 %v959_v49, %v915_v48 }
 0x13b   : > { %v2201_v54 = vadd.f32 %v1044_v44, %v1001_v47  ;;  %1095 = vmatmul.bf16.gmra.mxu0 %v365_v45 }
 0x13c   : > { %1139 = vmatmul.bf16.gmra.mxu1 %v366_v46 }
 0x13d   : > { %1183 = vmatmul.bf16.gmra.mxu2 %v367_v50 }
 0x13e   : > { %1227 = vmatmul.bf16.gmra.mxu3 %v368_v51 }
 0x140   : > { %v1003_v55 = vpop.f32.mrf.mxu2  ;;  %v917_v58 = vpop.f32.mrf.mxu0 }
 0x141   : > { %v1047_v56 = vpop.f32.mrf.mxu3  ;;  %v1004_v57 = vadd.f32 %v1003_v55, %v960_v52  ;;  %v961_v59 = vpop.f32.mrf.mxu1 }
 0x142   : > { %v962_v60 = vadd.f32 %v961_v59, %v917_v58 }
 0x143   : > { %v2203_v62 = vadd.f32 %v1047_v56, %v1004_v57 }
 0x148   : > { %v1005_v63 = vpop.f32.mrf.mxu2  ;;  %v920_v2 = vpop.f32.mrf.mxu0 }
 0x149   : > { %v1049_v0 = vpop.f32.mrf.mxu3  ;;  %v1006_v1 = vadd.f32 %v1005_v63, %v962_v60  ;;  %v964_v3 = vpop.f32.mrf.mxu1 }
 0x14a   : > { %v965_v5 = vadd.f32 %v964_v3, %v920_v2 }
 0x14b   : > { %v2205_v6 = vadd.f32 %v1049_v0, %v1006_v1 }
 0x150   : > { %v1008_v7 = vpop.f32.mrf.mxu2  ;;  %v922_v11 = vpop.f32.mrf.mxu0 }
 0x151   : > { %v1052_v9 = vpop.f32.mrf.mxu3  ;;  %v1009_v10 = vadd.f32 %v1008_v7, %v965_v5  ;;  %v966_v12 = vpop.f32.mrf.mxu1 }
 0x152   : > { %v967_v13 = vadd.f32 %v966_v12, %v922_v11 }
 0x153   : > { %v2207_v14 = vadd.f32 %v1052_v9, %v1009_v10 }
 0x158   : > { %v1010_v16 = vpop.f32.mrf.mxu2  ;;  %v1066_v19 = vpop.f32.mrf.mxu0 }
 0x159   : > { %v1054_v17 = vpop.f32.mrf.mxu3  ;;  %v1011_v18 = vadd.f32 %v1010_v16, %v967_v13  ;;  %v1110_v20 = vpop.f32.mrf.mxu1  ;;  %v1067_v22 = vadd.f32 %v1066_v19, %v2143_v53 }
 0x15b   : > { %v2209_v21 = vadd.f32 %v1054_v17, %v1011_v18  ;;  %v1111_v23 = vadd.f32 %v1110_v20, %v1067_v22 }
 0x160   : > { %v1154_v24 = vpop.f32.mrf.mxu2  ;;  %v1068_v28 = vpop.f32.mrf.mxu0 }
 0x161   : > { %v1198_v26 = vpop.f32.mrf.mxu3  ;;  %v1155_v27 = vadd.f32 %v1154_v24, %v1111_v23  ;;  %v1112_v29 = vpop.f32.mrf.mxu1  ;;  %v1069_v31 = vadd.f32 %v1068_v28, %v2153_v8 }
 0x163   : > { %v1199_v30 = vadd.f32 %v1198_v26, %v1155_v27  ;;  %v1113_v33 = vadd.f32 %v1112_v29, %v1069_v31 }
 0x165   : > { %1233 = vst [vmem:[%s2214_s23] sm:$0xff] %v1199_v30 }
 0x168   : > { %v1156_v35 = vpop.f32.mrf.mxu2  ;;  %v1071_v37 = vpop.f32.mrf.mxu0 }
 0x169   : > { %v1200_v36 = vpop.f32.mrf.mxu3  ;;  %v1157_v53 = vadd.f32 %v1156_v35, %v1113_v33  ;;  %v1115_v38 = vpop.f32.mrf.mxu1  ;;  %v1072_v40 = vadd.f32 %v1071_v37, %v2155_v15 }
 0x16b   : > { %v1201_v39 = vadd.f32 %v1200_v36, %v1157_v53  ;;  %v1116_v42 = vadd.f32 %v1115_v38, %v1072_v40 }
 0x16d   : > { %1234 = vst [vmem:[%s2214_s23 + $0x8] sm:$0xff] %v1201_v39 }
 0x170   : > { %v1159_v43 = vpop.f32.mrf.mxu2  ;;  %v1073_v45 = vpop.f32.mrf.mxu0 }
 0x171   : > { %v1203_v8 = vpop.f32.mrf.mxu3  ;;  %v1160_v44 = vadd.f32 %v1159_v43, %v1116_v42  ;;  %v1117_v46 = vpop.f32.mrf.mxu1  ;;  %v1074_v48 = vadd.f32 %v1073_v45, %v2165_v34 }
 0x173   : > { %v1204_v47 = vadd.f32 %v1203_v8, %v1160_v44  ;;  %v1118_v49 = vadd.f32 %v1117_v46, %v1074_v48 }
 0x175   : > { %1235 = vst [vmem:[%s2214_s23 + $0x10] sm:$0xff] %v1204_v47 }
 0x178   : > { %v1161_v50 = vpop.f32.mrf.mxu2  ;;  %v1076_v55 = vpop.f32.mrf.mxu0 }
 0x179   : > { %v1205_v51 = vpop.f32.mrf.mxu3  ;;  %v1162_v52 = vadd.f32 %v1161_v50, %v1118_v49  ;;  %v1120_v56 = vpop.f32.mrf.mxu1  ;;  %v1077_v57 = vadd.f32 %v1076_v55, %v2167_v41 }
 0x17b   : > { %v1206_v15 = vadd.f32 %v1205_v51, %v1162_v52  ;;  %v1121_v58 = vadd.f32 %v1120_v56, %v1077_v57 }
 0x17d   : > { %1236 = vst [vmem:[%s2214_s23 + $0x18] sm:$0xff] %v1206_v15 }
 0x180   : > { %v1164_v59 = vpop.f32.mrf.mxu2  ;;  %v1078_v0 = vpop.f32.mrf.mxu0 }
 0x181   : > { %v1208_v60 = vpop.f32.mrf.mxu3  ;;  %v1165_v63 = vadd.f32 %v1164_v59, %v1121_v58  ;;  %v1122_v1 = vpop.f32.mrf.mxu1  ;;  %v1079_v2 = vadd.f32 %v1078_v0, %v2177_v61 }
 0x183   : > { %v1209_v34 = vadd.f32 %v1208_v60, %v1165_v63  ;;  %v1123_v3 = vadd.f32 %v1122_v1, %v1079_v2 }
 0x185   : > { %1237 = vst [vmem:[%s2214_s23 + $0x20] sm:$0xff] %v1209_v34 }
 0x188   : > { %v1166_v5 = vpop.f32.mrf.mxu2  ;;  %v1081_v10 = vpop.f32.mrf.mxu0 }
 0x189   : > { %v1210_v7 = vpop.f32.mrf.mxu3  ;;  %v1167_v9 = vadd.f32 %v1166_v5, %v1123_v3  ;;  %v1125_v11 = vpop.f32.mrf.mxu1  ;;  %v1082_v12 = vadd.f32 %v1081_v10, %v2179_v4 }
 0x18b   : > { %v1211_v41 = vadd.f32 %v1210_v7, %v1167_v9  ;;  %v1126_v13 = vadd.f32 %v1125_v11, %v1082_v12 }
 0x18d   : > { %1238 = vst [vmem:[%s2214_s23 + $0x28] sm:$0xff] %v1211_v41 }
 0x190   : > { %v1169_v16 = vpop.f32.mrf.mxu2  ;;  %v1083_v19 = vpop.f32.mrf.mxu0 }
 0x191   : > { %v1213_v17 = vpop.f32.mrf.mxu3  ;;  %v1170_v18 = vadd.f32 %v1169_v16, %v1126_v13  ;;  %v1127_v20 = vpop.f32.mrf.mxu1  ;;  %v1084_v22 = vadd.f32 %v1083_v19, %v2189_v25 }
 0x193   : > { %v1214_v61 = vadd.f32 %v1213_v17, %v1170_v18  ;;  %v1128_v23 = vadd.f32 %v1127_v20, %v1084_v22 }
 0x195   : > { %1239 = vst [vmem:[%s2214_s23 + $0x30] sm:$0xff] %v1214_v61 }
 0x198   : > { %v1171_v24 = vpop.f32.mrf.mxu2  ;;  %v1086_v28 = vpop.f32.mrf.mxu0 }
 0x199   : > { %v1215_v26 = vpop.f32.mrf.mxu3  ;;  %v1172_v27 = vadd.f32 %v1171_v24, %v1128_v23  ;;  %v1130_v29 = vpop.f32.mrf.mxu1  ;;  %v1087_v30 = vadd.f32 %v1086_v28, %v2191_v32 }
 0x19b   : > { %v1216_v4 = vadd.f32 %v1215_v26, %v1172_v27  ;;  %v1131_v31 = vadd.f32 %v1130_v29, %v1087_v30 }
 0x19d   : > { %1240 = vst [vmem:[%s2214_s23 + $0x38] sm:$0xff] %v1216_v4 }
 0x1a0   : > { %v1174_v33 = vpop.f32.mrf.mxu2  ;;  %v1088_v53 = vpop.f32.mrf.mxu0 }
 0x1a1   : > { %v1218_v35 = vpop.f32.mrf.mxu3  ;;  %v1175_v36 = vadd.f32 %v1174_v33, %v1131_v31  ;;  %v1132_v37 = vpop.f32.mrf.mxu1  ;;  %v1089_v38 = vadd.f32 %v1088_v53, %v2201_v54 }
 0x1a3   : > { %v1219_v25 = vadd.f32 %v1218_v35, %v1175_v36  ;;  %v1133_v39 = vadd.f32 %v1132_v37, %v1089_v38 }
 0x1a5   : > { %1241 = vst [vmem:[%s2214_s23 + $0x40] sm:$0xff] %v1219_v25 }
 0x1a8   : > { %v1176_v40 = vpop.f32.mrf.mxu2  ;;  %v1091_v8 = vpop.f32.mrf.mxu0 }
 0x1a9   : > { %v1220_v42 = vpop.f32.mrf.mxu3  ;;  %v1177_v43 = vadd.f32 %v1176_v40, %v1133_v39  ;;  %v1135_v44 = vpop.f32.mrf.mxu1  ;;  %v1092_v45 = vadd.f32 %v1091_v8, %v2203_v62 }
 0x1ab   : > { %v1221_v32 = vadd.f32 %v1220_v42, %v1177_v43  ;;  %v1136_v46 = vadd.f32 %v1135_v44, %v1092_v45 }
 0x1ad   : > { %1242 = vst [vmem:[%s2214_s23 + $0x48] sm:$0xff] %v1221_v32 }
 0x1b0   : > { %v1179_v47 = vpop.f32.mrf.mxu2  ;;  %v1093_v50 = vpop.f32.mrf.mxu0 }
 0x1b1   : > { %v1223_v48 = vpop.f32.mrf.mxu3  ;;  %v1180_v49 = vadd.f32 %v1179_v47, %v1136_v46  ;;  %v1137_v51 = vpop.f32.mrf.mxu1  ;;  %v1094_v52 = vadd.f32 %v1093_v50, %v2205_v6 }
 0x1b3   : > { %v1224_v54 = vadd.f32 %v1223_v48, %v1180_v49  ;;  %v1138_v55 = vadd.f32 %v1137_v51, %v1094_v52 }
 0x1b5   : > { %1243 = vst [vmem:[%s2214_s23 + $0x50] sm:$0xff] %v1224_v54 }
 0x1b8   : > { %v1181_v56 = vpop.f32.mrf.mxu2  ;;  %v1096_v58 = vpop.f32.mrf.mxu0 }
 0x1b9   : > { %v1225_v15 = vpop.f32.mrf.mxu3  ;;  %v1182_v57 = vadd.f32 %v1181_v56, %v1138_v55  ;;  %v1097_v62 = vadd.f32 %v1096_v58, %v2207_v14  ;;  %v1140_v60 = vpop.f32.mrf.mxu1 }
 0x1bb   : > { %v1226_v59 = vadd.f32 %v1225_v15, %v1182_v57  ;;  %v1141_v63 = vadd.f32 %v1140_v60, %v1097_v62 }
 0x1bd   : > { %1244 = vst [vmem:[%s2214_s23 + $0x58] sm:$0xff] %v1226_v59 }
 0x1c0   : > { %v1184_v0 = vpop.f32.mrf.mxu2  ;;  %v1098_v2 = vpop.f32.mrf.mxu0 }
 0x1c1   : > { %v1228_v1 = vpop.f32.mrf.mxu3  ;;  %v1185_v34 = vadd.f32 %v1184_v0, %v1141_v63  ;;  %v1099_v3 = vadd.f32 %v1098_v2, %v2209_v21  ;;  %v1142_v5 = vpop.f32.mrf.mxu1 }
 0x1c3   : > { %v1229_v6 = vadd.f32 %v1228_v1, %v1185_v34  ;;  %v1143_v7 = vadd.f32 %v1142_v5, %v1099_v3 }
 0x1c5   : > { %1245 = vst [vmem:[%s2214_s23 + $0x60] sm:$0xff] %v1229_v6 }
 0x1c8   : > { %v1186_v9 = vpop.f32.mrf.mxu2 }
 0x1c9   : > { %v1187_v10 = vadd.f32 %v1186_v9, %v1143_v7  ;;  %v1230_v11 = vpop.f32.mrf.mxu3  ;;  %1254 = sbr.rel (!%p1985_p11) target bundleno = 493 (0x1ed), region = 40 }
 0x1cb   : > { %v1231_v41 = vadd.f32 %v1230_v11, %v1187_v10 }
 0x1cd   : > { %1246 = vst [vmem:[%s2214_s23 + $0x68] sm:$0xff] %v1231_v41 }
 0x1ce   : > { %s2328_s19 = smov (!%p1257_p6, %s1256_s19), 14 }
 0x1cf   : > { %s1622_s25 = sshll.u32 %s2328_s19, 3 }
 0x1d0   : > { %s1260_s26 = ssub.s32 112, %s1622_s25 }
 0x1d1   : > { %s1261_s30 = sshll.u32 %s1260_s26, 4 }
 0x1d2   : > { %1262 = vsyncadd %s1248_s6, %s1261_s30  ;;  %p2251_p13 = scmp.ne.s32.totalorder %s1622_s25, 0  ;;  %s1696_s24 = smul.u32 112, %s1954_s13 }
 0x1d3   : > { %s1267_s27 = sshll.u32 %s2214_s23, 4  ;;  %s1626_s28 = sshll.u32 %s2328_s19, 7  ;;  %s2261_s27 = int_to_ptr.vmem [resolvable:$true] %s1267_s27 }
 0x1d4   : > { %s1265_s3 = scalar_lea.hbm %s2307_s2, %s1696_s24  ;;  %s1826_s8 = sshra.s32 %s2261_s27, 4  ;;  %s1827_s8 = int_to_ptr.vmem [resolvable:$true] %s1826_s8 }
 0x1d5   : > { %s1269_s5 = sshll.u32 %s1265_s3, 4  ;;  %s1828_s14 = sshrl.u32 %s1626_s28, 4  ;;  %s2263_s5 = int_to_ptr.hbm [resolvable:$true] %s1269_s5 }
 0x1d6   : > { %s1833_s17 = scalar_lea.vmem %s1827_s8, %s1828_s14  ;;  %s1915_s13 = smov [#allocation7]  }
 0x1d7   : > { %p1834_p11 = scmp.ne.s32.totalorder %s1827_s8, %s1833_s17  ;;  %s1837_s20 = scalar_lea.vmem %s1915_s13, 224 }
 0x1d8   : > { %p1839_p9 = scmp.lt.s32.totalorder %s1837_s20, %s1833_s17 }
 0x1d9   : > { %p1835_p2 = pnand %p1834_p11, %p2251_p13 }
 0x1db   : > { %p1836_p5 = pneg %p1835_p2 }
 0x1dd   : > { %p1841_p10 = pnand %p1839_p9, %p1836_p5 }
 0x1df   : > { %1844 = shalt.err (!%p1841_p10)
}
 0x1e0   : > { %s1845_s23 = sshra.s32 %s2263_s5, 4  ;;  %s1856_s30 = scalar_lea.hbm %s2307_s2, 200  ;;  %s1846_s23 = int_to_ptr.hbm [resolvable:$true] %s1845_s23 }
 0x1e1   : > { %s1852_s16 = scalar_lea.hbm %s1846_s23, %s1828_s14  ;;  %p1857_p7 = scmp.lt.s32.totalorder %s1846_s23, %s2307_s2 }
 0x1e2   : > { %p1853_p1 = scmp.ne.s32.totalorder %s1846_s23, %s1852_s16  ;;  %p1858_p8 = scmp.lt.s32.totalorder %s1856_s30, %s1852_s16 }
 0x1e4   : > { %p1854_p0 = pnand %p1853_p1, %p2251_p13  ;;  %p1859_p4 = por %p1858_p8, %p1857_p7 }
 0x1e6   : > { %p1855_p3 = pneg %p1854_p0 }
 0x1e8   : > { %p1860_p12 = pnand %p1859_p4, %p1855_p3 }
 0x1ea   : > { %1863 = shalt.err (!%p1860_p12)
}
 0x1eb   : > { %s1916_s7 = smov 128   ;;  %s1917_s3 = smov 8  }
 0x1ec   : > { %1275 = dma.vmem_to_hbm [thread:$0]  (%p2251_p13), %s2261_s27, %s1626_s28, %s2263_s5, %s1248_s6, %s1916_s7, %s1916_s7, %s1917_s3  }
 0x1ed PF: > { %s1284_s8 = sand.u32 1, %s1895_s9   ;;  %p2319_p6 = scmp.ne.s32.totalorder %s2313_s22, 0 }
 0x1ee   : > { %p2320_p11 = scmp.ge.s32.totalorder %s1907_s12, 2  ;;  %s1285_s14 = scalar_lea.sflag [#allocation4], %s1284_s8 }
 0x1f0   : > { %p1712_p2 = pnand %p2320_p11, %p2319_p6 }
 0x1f2   : > { %p1713_p5 = pneg %p1712_p2 }
 0x1f4   : > { %1890 = dma.done.wait (%p1713_p5), %s1285_s14, 1792  }
 0x1f5   : > { %1892 = vsyncadd (%p1713_p5), %s1285_s14, 4294965504  ;;  %p16_p9 = scmp.ge.s32.totalorder %s1958_s15, 4   ;;  %s2321_s9 = smov %s1899_s10 }
 0x1f6   : > { %s2322_s10 = smov %s1903_s11  ;;  %s2323_s11 = smov %s1970_s18 }
 0x1f7   : > { %s2324_s12 = smov %s1958_s15  ;;  %18 = sbr.rel (!%p16_p9) target bundleno = 6 (0x6), region = 77 }
 0x1fc   :  { %1291 = vsyncpa [#allocation3], 1 }
 0x1fd   :  { %1293 = vsyncpa [#allocation3 + $0x1], 1 }
 0x1fe   :  { %1294 = vsyncpa [#allocation6], 1 }
 0x1ff   :  { %1295 = vsyncpa [#allocation4], 1 }
 0x200   :  { %1297 = vsyncpa [#allocation4 + $0x1], 1 }

</bundles_post_ra>
